<compile_context>
chip_gen: v5e
topology: v5e:2x2
jax: 0.10.0
libtpu: 0.0.40
codegen_flags: <defaults>
</compile_context>

<pallas_src>
import jax
import jax.numpy as jnp
from jax.experimental import pallas as pl
from jax.experimental.pallas import tpu as pltpu


def _round_up(n: int, m: int) -> int:
    return ((n + m - 1) // m) * m


def _round_down(n: int, m: int) -> int:
    return (n // m) * m


def _vmem_capacity_bytes() -> int:
    try:
        info = pltpu.get_tpu_info()
        cap = int(getattr(info, "vmem_capacity_bytes", 0))
        if cap > 0:
            return cap
    except Exception:
        pass
    return 64 * 1024 * 1024  # conservative fallback: v7x per-TensorCore VMEM


def _make_kernel(S: int, TS: int, needs_seq_mask: bool):
    inv_s = 1.0 / float(S)

    def kernel(x_ref, w1_ref, b1_ref, w2_ref, b2_ref, o_ref, acc_ref):
        # x: (TB, TS, D)  w1: (D, Pp)  b1: (1, Pp)  w2: (Pp, Pp)  b2: (1, Pp)
        # o: (TB, Pp)     acc: (TB, D) f32
        s = pl.program_id(1)

        @pl.when(s == 0)
        def _():
            acc_ref[...] = jnp.zeros_like(acc_ref)

        x = x_ref[...].astype(jnp.float32)
        if needs_seq_mask:
            # Only the last sequence tile is ragged; the compare is true for
            # every row of full tiles, so masking unconditionally is exact.
            seq = s * TS + jax.lax.broadcasted_iota(jnp.int32, (1, TS, 1), 1)
            x = jnp.where(seq < S, x, 0.0)
        acc_ref[...] += jnp.sum(x, axis=1)

        @pl.when(s == pl.num_programs(1) - 1)
        def _():
            h = acc_ref[...] * inv_s                                  # mean over S
            z1 = jnp.dot(h, w1_ref[...], preferred_element_type=jnp.float32)
            z1 = jnp.maximum(z1 + b1_ref[...], 0.0)                   # (TB, Pp)
            z2 = jnp.dot(z1, w2_ref[...], preferred_element_type=jnp.float32)
            o_ref[...] = (z2 + b2_ref[...]).astype(o_ref.dtype)       # (TB, Pp)

    return kernel


def contrastive_head(x, w1, b1, w2, b2, *, block_b=64):
    """x: (B, S, D); w1: (D, P); b1: (1, P); w2: (P, P); b2: (1, P) -> (B, P) f32."""
    B, S, D = x.shape
    P = w1.shape[1]

    # Pad only the tiny projection weights so the output lane dim is a
    # multiple of 128 (lane-dense, unmasked stores).  x is never padded.
    Pp = _round_up(P, 128)
    w1_p = jnp.pad(w1, ((0, 0), (0, Pp - P)))
    b1_p = jnp.pad(b1, ((0, 0), (0, Pp - P)))
    w2_p = jnp.pad(w2, ((0, Pp - P), (0, Pp - P)))
    b2_p = jnp.pad(b2, ((0, 0), (0, Pp - P)))

    x_item = x.dtype.itemsize
    w_item = w1_p.dtype.itemsize

    # ---------------- per-generation VMEM budget ----------------
    cap = _vmem_capacity_bytes()          # 128 MiB on v5e/v6e, 64 MiB on v7x
    tile_budget = int(cap * 0.70)         # working-set budget used for tiling

    # ---------------- batch tile ----------------
    if B < 8:
        TB = B                            # single full-extent batch block
    else:
        TB = min(block_b, _round_down(B, 8))
        # Give the "parallel" batch axis >= 2 tiles so both v7x TensorCores
        # get work (no effect on v5e/v6e).
        if B >= 16 and pl.cdiv(B, TB) < 2:
            TB = max(8, _round_down(pl.cdiv(B, 2), 8))

    def fixed_bytes(tb):
        # double-buffered resident weights + double-buffered out tile + f32 acc
        return (2 * (D * Pp + Pp * Pp + 2 * Pp) * w_item
                + 2 * tb * Pp * 4
                + tb * D * 4)

    min_ts = S if S <= 8 else 8
    while TB > 8 and fixed_bytes(TB) + 2 * TB * min_ts * D * x_item > tile_budget:
        TB = max(8, _round_down(TB // 2, 8))

    # ---------------- sequence tile: fill the remaining budget ----------------
    rem = max(0, tile_budget - fixed_bytes(TB))
    max_ts = rem // max(1, 2 * TB * D * x_item)   # double-buffered x tile
    if S <= 8 or max_ts >= S:
        TS = S                                    # full extent (always valid)
    else:
        TS = max(8, _round_down(min(max_ts, S), 8))

    grid_b = pl.cdiv(B, TB)
    grid_s = pl.cdiv(S, TS)
    Bp = grid_b * TB                              # output rows >= B; tail sliced off
    needs_seq_mask = (S % TS) != 0

    est = fixed_bytes(TB) + 2 * TB * TS * D * x_item
    vmem_limit = min(int(cap * 0.92), max(int(1.25 * est), 32 * 1024 * 1024))

    kernel = _make_kernel(S, TS, needs_seq_mask)

    out_p = pl.pallas_call(
        kernel,
        out_shape=jax.ShapeDtypeStruct((Bp, Pp), jnp.float32),
        grid_spec=pltpu.PrefetchScalarGridSpec(
            num_scalar_prefetch=0,
            grid=(grid_b, grid_s),
            in_specs=[
                # streamed activation tiles; last dim = full D (no padding)
                pl.BlockSpec((TB, TS, D), lambda i, s: (i, s, 0)),
                # weights / biases: constant block index -> resident in VMEM
                pl.BlockSpec((D, Pp), lambda i, s: (0, 0)),
                pl.BlockSpec((1, Pp), lambda i, s: (0, 0)),
                pl.BlockSpec((Pp, Pp), lambda i, s: (0, 0)),
                pl.BlockSpec((1, Pp), lambda i, s: (0, 0)),
            ],
            out_specs=pl.BlockSpec((TB, Pp), lambda i, s: (i, 0)),
            scratch_shapes=[pltpu.VMEM((TB, D), jnp.float32)],
        ),
        compiler_params=pltpu.CompilerParams(
            dimension_semantics=("parallel", "arbitrary"),
            vmem_limit_bytes=vmem_limit,
        ),
    )(x, w1_p, b1_p, w2_p, b2_p)

    return out_p[:B, :P]


def reference(x, w1, b1, w2, b2):
    h = jnp.mean(x, axis=1)
    z1 = jnp.maximum(h @ w1 + b1, 0.0)
    return z1 @ w2 + b2


if __name__ == "__main__":
    B, S, D, P = 2, 8, 32, 64   # batch, seq, model_dim, projection_dim

    key = jax.random.PRNGKey(0)
    kx, k1, k2, k3, k4 = jax.random.split(key, 5)

    # "encoder output" stand-in
    x = jax.random.normal(kx, (B, S, D), dtype=jnp.float32)

    # deterministic Linear params (PyTorch-like uniform init bounds)
    bound1 = 1.0 / jnp.sqrt(D)
    w1 = jax.random.uniform(k1, (D, P), jnp.float32, -bound1, bound1)
    b1 = jax.random.uniform(k2, (1, P), jnp.float32, -bound1, bound1)
    bound2 = 1.0 / jnp.sqrt(P)
    w2 = jax.random.uniform(k3, (P, P), jnp.float32, -bound2, bound2)
    b2 = jax.random.uniform(k4, (1, P), jnp.float32, -bound2, bound2)

    z = contrastive_head(x, w1, b1, w2, b2)
    jax.block_until_ready(z)

    z_ref = reference(x, w1, b1, w2, b2)
    assert z.shape == (B, P)
    assert jnp.allclose(z, z_ref, atol=1e-5, rtol=1e-5)

    print("KERNEL_OK")
</pallas_src>

<mosaic_0001>
module attributes {stable_mosaic.version = 11 : i64} {
  func.func @kernel(%arg0: i32, %arg1: i32, %arg2: memref<2x8x32xf32, #tpu.memory_space<vmem>>, %arg3: memref<32x128xf32, #tpu.memory_space<vmem>>, %arg4: memref<1x128xf32, #tpu.memory_space<vmem>>, %arg5: memref<128x128xf32, #tpu.memory_space<vmem>>, %arg6: memref<1x128xf32, #tpu.memory_space<vmem>>, %arg7: memref<2x128xf32, #tpu.memory_space<vmem>>, %arg8: memref<2x32xf32, #tpu.memory_space<vmem>>) attributes {dimension_semantics = [#tpu.dimension_semantics<parallel>, #tpu.dimension_semantics<arbitrary>], iteration_bounds = array<i64: 1, 1>, scalar_prefetch = 0 : i64, scratch_operands = 1 : i64, tpu.core_type = #tpu.core_type<tc>, window_params = [{transform_indices = @transform_0, window_bounds = array<i64: 2, 8, 32>}, {pipeline_mode = #tpu.pipeline_mode<synchronous>, transform_indices = @transform_1, window_bounds = array<i64: 32, 128>}, {pipeline_mode = #tpu.pipeline_mode<synchronous>, transform_indices = @transform_2, window_bounds = array<i64: 1, 128>}, {pipeline_mode = #tpu.pipeline_mode<synchronous>, transform_indices = @transform_3, window_bounds = array<i64: 128, 128>}, {pipeline_mode = #tpu.pipeline_mode<synchronous>, transform_indices = @transform_4, window_bounds = array<i64: 1, 128>}, {transform_indices = @transform_5, window_bounds = array<i64: 2, 128>}]} {
    %c0_i32 = arith.constant 0 : i32
    %0 = arith.cmpi eq, %arg1, %c0_i32 : i32
    %1 = arith.extui %0 : i1 to i32
    %c0_i32_0 = arith.constant 0 : i32
    %2 = arith.cmpi ne, %1, %c0_i32_0 : i32
    scf.if %2 {
      %cst_9 = arith.constant 0.000000e+00 : f32
      %11 = vector.broadcast %cst_9 : f32 to vector<2x32xf32>
      %c0_10 = arith.constant 0 : index
      %c0_11 = arith.constant 0 : index
      %12 = vector.load %arg8[%c0_10, %c0_11] : memref<2x32xf32, #tpu.memory_space<vmem>>, vector<2x32xf32>
      tpu.vector_store %arg8[%c0_10, %c0_11], %11 {strides = array<i32>} : memref<2x32xf32, #tpu.memory_space<vmem>>, vector<2x32xf32>,
    } else {
    }
    %c0 = arith.constant 0 : index
    %c0_1 = arith.constant 0 : index
    %c0_2 = arith.constant 0 : index
    %3 = vector.load %arg2[%c0, %c0_1, %c0_2] : memref<2x8x32xf32, #tpu.memory_space<vmem>>, vector<2x8x32xf32>
    %c0_3 = arith.constant 0 : index
    %c0_4 = arith.constant 0 : index
    %4 = vector.load %arg8[%c0_3, %c0_4] : memref<2x32xf32, #tpu.memory_space<vmem>>, vector<2x32xf32>
    %cst = arith.constant dense<0.000000e+00> : vector<2x32xf32>
    %5 = vector.multi_reduction <add>, %3, %cst [1] : vector<2x8x32xf32> to vector<2x32xf32>
    %6 = arith.addf %4, %5 : vector<2x32xf32>
    %c0_5 = arith.constant 0 : index
    %c0_6 = arith.constant 0 : index
    %7 = vector.load %arg8[%c0_5, %c0_6] : memref<2x32xf32, #tpu.memory_space<vmem>>, vector<2x32xf32>
    tpu.vector_store %arg8[%c0_5, %c0_6], %6 {strides = array<i32>} : memref<2x32xf32, #tpu.memory_space<vmem>>, vector<2x32xf32>,
    %c0_i32_7 = arith.constant 0 : i32
    %8 = arith.cmpi eq, %arg1, %c0_i32_7 : i32
    %9 = arith.extui %8 : i1 to i32
    %c0_i32_8 = arith.constant 0 : i32
    %10 = arith.cmpi ne, %9, %c0_i32_8 : i32
    scf.if %10 {
      %c0_9 = arith.constant 0 : index
      %c0_10 = arith.constant 0 : index
      %11 = vector.load %arg8[%c0_9, %c0_10] : memref<2x32xf32, #tpu.memory_space<vmem>>, vector<2x32xf32>
      %cst_11 = arith.constant 1.250000e-01 : f32
      %12 = vector.broadcast %cst_11 : f32 to vector<2x32xf32>
      %13 = arith.mulf %11, %12 : vector<2x32xf32>
      %c0_12 = arith.constant 0 : index
      %c0_13 = arith.constant 0 : index
      %14 = vector.load %arg3[%c0_12, %c0_13] : memref<32x128xf32, #tpu.memory_space<vmem>>, vector<32x128xf32>
      %cst_14 = arith.constant dense<0.000000e+00> : vector<2x128xf32>
      %15 = tpu.matmul %13, %14, %cst_14 {dimension_numbers = #tpu.dot_dimension_numbers<[1], [0], [0], [1], [0, 0, 1, 1], [], []>} : vector<2x32xf32>, vector<32x128xf32>, vector<2x128xf32> -> vector<2x128xf32>
      %c0_15 = arith.constant 0 : index
      %c0_16 = arith.constant 0 : index
      %16 = vector.load %arg4[%c0_15, %c0_16] : memref<1x128xf32, #tpu.memory_space<vmem>>, vector<1x128xf32>
      %17 = vector.broadcast %16 : vector<1x128xf32> to vector<2x128xf32>
      %18 = arith.addf %15, %17 : vector<2x128xf32>
      %cst_17 = arith.constant 0.000000e+00 : f32
      %19 = vector.broadcast %cst_17 : f32 to vector<2x128xf32>
      %20 = arith.maximumf %18, %19 : vector<2x128xf32>
      %c0_18 = arith.constant 0 : index
      %c0_19 = arith.constant 0 : index
      %21 = vector.load %arg5[%c0_18, %c0_19] : memref<128x128xf32, #tpu.memory_space<vmem>>, vector<128x128xf32>
      %cst_20 = arith.constant dense<0.000000e+00> : vector<2x128xf32>
      %22 = tpu.matmul %20, %21, %cst_20 {dimension_numbers = #tpu.dot_dimension_numbers<[1], [0], [0], [1], [0, 0, 1, 1], [], []>} : vector<2x128xf32>, vector<128x128xf32>, vector<2x128xf32> -> vector<2x128xf32>
      %c0_21 = arith.constant 0 : index
      %c0_22 = arith.constant 0 : index
      %23 = vector.load %arg6[%c0_21, %c0_22] : memref<1x128xf32, #tpu.memory_space<vmem>>, vector<1x128xf32>
      %24 = vector.broadcast %23 : vector<1x128xf32> to vector<2x128xf32>
      %25 = arith.addf %22, %24 : vector<2x128xf32>
      %c0_23 = arith.constant 0 : index
      %c0_24 = arith.constant 0 : index
      %26 = vector.load %arg7[%c0_23, %c0_24] : memref<2x128xf32, #tpu.memory_space<vmem>>, vector<2x128xf32>
      tpu.vector_store %arg7[%c0_23, %c0_24], %25 {strides = array<i32>} : memref<2x128xf32, #tpu.memory_space<vmem>>, vector<2x128xf32>,
    } else {
    }
    return
  }
  func.func @transform_0(%arg0: i32, %arg1: i32) -> (i32, i32, i32) {
    %c0_i32 = arith.constant 0 : i32
    %c0_i32_0 = arith.constant 0 : i32
    return %arg0, %arg1, %c0_i32 : i32, i32, i32
  }
  func.func @transform_1(%arg0: i32, %arg1: i32) -> (i32, i32) {
    %c0_i32 = arith.constant 0 : i32
    %c0_i32_0 = arith.constant 0 : i32
    %c0_i32_1 = arith.constant 0 : i32
    return %c0_i32, %c0_i32_0 : i32, i32
  }
  func.func @transform_2(%arg0: i32, %arg1: i32) -> (i32, i32) {
    %c0_i32 = arith.constant 0 : i32
    %c0_i32_0 = arith.constant 0 : i32
    %c0_i32_1 = arith.constant 0 : i32
    return %c0_i32, %c0_i32_0 : i32, i32
  }
  func.func @transform_3(%arg0: i32, %arg1: i32) -> (i32, i32) {
    %c0_i32 = arith.constant 0 : i32
    %c0_i32_0 = arith.constant 0 : i32
    %c0_i32_1 = arith.constant 0 : i32
    return %c0_i32, %c0_i32_0 : i32, i32
  }
  func.func @transform_4(%arg0: i32, %arg1: i32) -> (i32, i32) {
    %c0_i32 = arith.constant 0 : i32
    %c0_i32_0 = arith.constant 0 : i32
    %c0_i32_1 = arith.constant 0 : i32
    return %c0_i32, %c0_i32_0 : i32, i32
  }
  func.func @transform_5(%arg0: i32, %arg1: i32) -> (i32, i32) {
    %c0_i32 = arith.constant 0 : i32
    %c0_i32_0 = arith.constant 0 : i32
    return %arg0, %c0_i32 : i32, i32
  }
}

</mosaic_0001>

<bundles_post_ra>
// kernel: tpu_custom_call.1
= control target key start
LH: loop header
LB: loop body
LE: loop exit
PB: predicated region body
PF: predicated region fallthrough
CT: control target
= control target key end

     0   :  { %10 = vsyncpa [#allocation4], 0  ;;  %s368_s0 = inlined_call_operand.hbm [shape: f32[2,8,32], index: 0, kind: input, shape index: {}]   ;;  %s369_s1 = inlined_call_operand.hbm [shape: f32[32,128], index: 1, kind: input, shape index: {}]   ;;  %s370_s2 = inlined_call_operand.vmem [shape: f32[1,128], index: 2, kind: input, shape index: {}]   ;;  %s371_s3 = inlined_call_operand.hbm [shape: f32[128,128], index: 3, kind: input, shape index: {}]   ;;  %s372_s4 = inlined_call_operand.vmem [shape: f32[1,128], index: 4, kind: input, shape index: {}]   ;;  %s373_s5 = inlined_call_operand.hbm [shape: f32[2,128], index: 5, kind: output, shape index: {}]  }
   0x1   :  { %11 = vsyncpa [#allocation7], 0 }
   0x2   :  { %12 = vsyncpa [#allocation5], 0  ;;  %s30_s20 = sshll.u32 %s369_s1, 4  ;;  %s308_s21 = smov [#allocation6]   ;;  %s31_s20 = int_to_ptr.hbm [resolvable:$true] %s30_s20 }
   0x3   :  { %s32_s22 = sshll.u32 %s308_s21, 4  ;;  %s17_s25 = sshll.u32 %s368_s0, 4  ;;  %s33_s22 = int_to_ptr.vmem [resolvable:$true] %s32_s22  ;;  %s18_s25 = int_to_ptr.hbm [resolvable:$true] %s17_s25 }
   0x4   :  { %s309_s26 = smov 128   ;;  %s310_s27 = smov 8  }
   0x5   :  { %38 = dma.hbm_to_vmem [thread:$0]  %s31_s20, 512, %s33_s22, [#allocation7], %s309_s26, %s309_s26, %s310_s27  }
   0x6   :  { %s311_s28 = smov [#allocation3]   ;;  %s45_s7 = sshll.u32 %s371_s3, 4  ;;  %s46_s7 = int_to_ptr.hbm [resolvable:$true] %s45_s7 }
   0x7   :  { %s19_s29 = sshll.u32 %s311_s28, 4  ;;  %s312_s1 = smov [#allocation8]   ;;  %s20_s29 = int_to_ptr.vmem [resolvable:$true] %s19_s29 }
   0x8   :  { %25 = dma.hbm_to_vmem [thread:$0]  %s18_s25, 256, %s20_s29, [#allocation4], %s309_s26, %s309_s26, %s310_s27  }
   0x9   :  { %s47_s8 = sshll.u32 %s312_s1, 4  ;;  %s48_s8 = int_to_ptr.vmem [resolvable:$true] %s47_s8 }
   0xa   :  { %53 = dma.hbm_to_vmem [thread:$0]  %s46_s7, 2048, %s48_s8, [#allocation7], %s309_s26, %s309_s26, %s310_s27  }
   0xb   :  { %302 = dma.done.wait [#allocation4], 256  }
   0xc   :  { %303 = vsyncadd [#allocation4], 4294967040 }
   0xd   :  { %304 = dma.done.wait [#allocation7], 2560  }
   0xe   :  { %305 = vsyncadd [#allocation7], 4294964736  ;;  %vm72_vm0 = vcmask 254976   ;;  %v313_v0 = vmov 0.0   ;;  %vm77_vm1 = vcmask 261120   ;;  %v108_v1 = vld [vmem:[#allocation6 + $0x18] sm:$0xff] }
   0xf   :  { %73 = vst.msk [vmem:[#allocation2] sm:$0x3] %vm72_vm0, %v313_v0  ;;  %v107_v2 = vld [vmem:[#allocation6 + $0x10] sm:$0xff]  ;;  %128 = vmatpush.msra.mxu0 %v108_v1  ;;  %v75_v4 = vld [vmem:[#allocation3 + $0x8] sm:$0xff]  ;;  %v106_v5 = vld [vmem:[#allocation6 + $0x8] sm:$0xff]  ;;  %vm94_vm2 = vcmask 1041409  }
  0x10   :  { %v74_v3 = vld [vmem:[#allocation3] sm:$0xff]  ;;  %v85_v7 = vsel %vm77_vm1, %v75_v4, 0.0  ;;  %v152_v8 = vld [vmem:[#allocation8 + $0x78] sm:$0xff]  ;;  %v105_v12 = vld [vmem:[#allocation6] sm:$0xff]  ;;  %s314_s11 = smov [#allocation9]   ;;  %s185_s15 = sshll.u32 %s373_s5, 4  ;;  %s186_s15 = int_to_ptr.hbm [resolvable:$true] %s185_s15 }
  0x11   :  { %v78_v6 = vsel %vm77_vm1, %v74_v3, 0.0  ;;  %v151_v9 = vld [vmem:[#allocation8 + $0x70] sm:$0xff]  ;;  %129 = vmatpush.msra.mxu0 %v107_v2  ;;  %v86_v11 = vrot.slane %v85_v7, 4  ;;  %157 = vmatpush.msra.mxu1 %v152_v8  ;;  %v150_v13 = vld [vmem:[#allocation8 + $0x68] sm:$0xff]  ;;  %v149_v16 = vld [vmem:[#allocation8 + $0x60] sm:$0xff]  ;;  %s183_s12 = sshll.u32 %s314_s11, 4  ;;  %s184_s12 = int_to_ptr.vmem [resolvable:$true] %s183_s12 }
  0x12   :  { %v79_v10 = vrot.slane %v78_v6, 4  ;;  %v148_v19 = vld [vmem:[#allocation8 + $0x58] sm:$0xff]  ;;  %v147_v22 = vld [vmem:[#allocation8 + $0x50] sm:$0xff]  ;;  %v146_v25 = vld [vmem:[#allocation8 + $0x48] sm:$0xff] }
  0x13   :  { %130 = vmatpush.msra.mxu0 %v106_v5  ;;  %v87_v15 = vadd.f32 %v86_v11, %v85_v7  ;;  %158 = vmatpush.msra.mxu1 %v151_v9  ;;  %v145_v29 = vld [vmem:[#allocation8 + $0x40] sm:$0xff]  ;;  %v144_v32 = vld [vmem:[#allocation8 + $0x38] sm:$0xff]  ;;  %v143_v33 = vld [vmem:[#allocation8 + $0x30] sm:$0xff] }
  0x14   :  { %v80_v14 = vadd.f32 %v79_v10, %v78_v6  ;;  %v142_v34 = vld [vmem:[#allocation8 + $0x28] sm:$0xff]  ;;  %v141_v35 = vld [vmem:[#allocation8 + $0x20] sm:$0xff]  ;;  %v140_v36 = vld [vmem:[#allocation8 + $0x18] sm:$0xff] }
  0x15   :  { %131 = vmatpush.msra.mxu0 %v105_v12  ;;  %v88_v18 = vrot.slane %v87_v15, 2  ;;  %159 = vmatpush.msra.mxu1 %v150_v13  ;;  %v139_v39 = vld [vmem:[#allocation8 + $0x10] sm:$0xff]  ;;  %v138_v40 = vld [vmem:[#allocation8 + $0x8] sm:$0xff]  ;;  %v137_v41 = vld [vmem:[#allocation8] sm:$0xff] }
  0x16   :  { %v81_v17 = vrot.slane %v80_v14, 2  ;;  %v76_v26 = vld [vmem:[#allocation2] sm:$0x3] }
  0x17   :  { %v89_v21 = vadd.f32 %v88_v18, %v87_v15  ;;  %160 = vmatpush.msra.mxu1 %v149_v16  ;;  %v204_v42 = vld [vmem:[%s370_s2] ss:$0 sm:$0xff] }
  0x18   :  { %v82_v20 = vadd.f32 %v81_v17, %v80_v14  ;;  %v205_v46 = vld [vmem:[%s372_s4] ss:$0 sm:$0xff] }
  0x19   :  { %v90_v24 = vrot.slane %v89_v21, 1  ;;  %161 = vmatpush.msra.mxu1 %v148_v19 }
  0x1a   :  { %v83_v23 = vrot.slane %v82_v20, 1 }
  0x1b   :  { %v91_v28 = vadd.f32 %v90_v24, %v89_v21  ;;  %162 = vmatpush.msra.mxu1 %v147_v22 }
  0x1c   :  { %v84_v27 = vadd.f32 %v83_v23, %v82_v20 }
  0x1d   :  { %163 = vmatpush.msra.mxu1 %v146_v25 }
  0x1e   :  { %v95_v30 = vsel %vm94_vm2, %v91_v28, %v84_v27 }
  0x1f   :  { %v97_v31 = vadd.f32 %v95_v30, %v76_v26  ;;  %164 = vmatpush.msra.mxu1 %v145_v29 }
  0x21   :  { %99 = vst.msk [vmem:[#allocation2] sm:$0x3] %vm72_vm0, %v97_v31  ;;  %165 = vmatpush.msra.mxu1 %v144_v32 }
  0x23   :  { %166 = vmatpush.msra.mxu1 %v143_v33 }
  0x25   :  { %167 = vmatpush.msra.mxu1 %v142_v34 }
  0x27   :  { %168 = vmatpush.msra.mxu1 %v141_v35 }
  0x28   :  { %v103_v37 = vld [vmem:[#allocation2] sm:$0x3] }
  0x29   :  { %v104_v38 = vmul.f32 0.125, %v103_v37  ;;  %169 = vmatpush.msra.mxu1 %v140_v36 }
  0x2b   :  { %196 = vmatmul.msk.f32.vlgmr.msra.gmra.mxu0 %vm77_vm1, %v104_v38  ;;  %170 = vmatpush.msra.mxu1 %v139_v39 }
  0x2d   :  { %171 = vmatpush.msra.mxu1 %v138_v40 }
  0x2f   :  { %172 = vmatpush.msra.mxu1 %v137_v41 }
  0xa8   :  { %v133_v43 = vpop.f32.mrf.mxu0 }
  0xa9   :  { %v134_v44 = vadd.f32 %v204_v42, %v133_v43 }
  0xab   :  { %v136_v45 = vmax.f32 %v134_v44, 0.0 }
  0xad   :  { %173 = vmatmul.f32.vlgmr.msra.gmra.mxu1 %v136_v45 }
 0x12a   :  { %v174_v47 = vpop.f32.mrf.mxu1 }
 0x12b   :  { %v175_v48 = vadd.f32 %v205_v46, %v174_v47 }
 0x12d   :  { %177 = vst [vmem:[#allocation9] sm:$0x3] %v175_v48 }
 0x12e   :  { %188 = dma.vmem_to_hbm [thread:$0]  %s184_s12, 32, %s186_s15, [#allocation5]  }
 0x12f   :  { %306 = dma.done.wait [#allocation5], 32  }
 0x130   :  { %307 = vsyncadd [#allocation5], 4294967264 }
 0x131   :  { %193 = vsyncpa [#allocation4], 1 }
 0x132   :  { %194 = vsyncpa [#allocation7], 1 }
 0x133   :  { %195 = vsyncpa [#allocation5], 1 }

</bundles_post_ra>
